<compile_context>
chip_gen: v7x
topology: tpu7x:2x2x1
jax: 0.10.0
libtpu: 0.0.40
codegen_flags: <defaults>
</compile_context>

<pallas_src>
import jax
import jax.numpy as jnp
from jax.experimental import pallas as pl
from jax.experimental.pallas import tpu as pltpu


def gcnc_mlp_kernel(x_ref, m_ref, w1_ref, b1_ref, w2_ref, b2_ref, o_ref):
    """Single invocation; all operands fully resident in VMEM.

    x_ref  : (Bp, Np, C1p)   dense cochain features, dims interleaved on lanes
    m_ref  : (Bp, Np, C1p)   validity mask broadcast over feature lanes
    w1_ref : (C1p, C2p)      block-diagonal fused lin1 weight
    b1_ref : (1, C2p)        concatenated lin1 biases
    w2_ref : (C2p, OUTp)     row-tiled lin2 weight (absorbs the dim-sum readout)
    b2_ref : (1, OUTp)       lin2 bias (lane-padded)
    o_ref  : (Bp, OUTp)      output (lane/sublane-dense; wrapper slices back)
    """
    # Masked-sum readout for all dims at once: VPU multiply + sublane reduce
    # over N.  No MXU involvement, no degenerate-shape relayouts.
    pooled = jnp.sum(x_ref[...] * m_ref[...], axis=1)            # (Bp, C1p)

    # Fused lin1 (all cochain dims in one block-diagonal matmul) + relu.
    h = jnp.dot(pooled, w1_ref[...], preferred_element_type=jnp.float32)
    h = jnp.maximum(h + b1_ref[...], 0.0)                        # (Bp, C2p)

    # lin2 with W2 row-tiled dims x: the final 'sum' readout happens inside the
    # matmul K dimension.  Unmasked, full-vreg store.
    y = jnp.dot(h, w2_ref[...], preferred_element_type=jnp.float32) + b2_ref[...]
    o_ref[...] = y.astype(o_ref.dtype)


def _round_up(x, m):
    return ((x + m - 1) // m) * m


def gcnc_mlp_forward(x_dense, mask, w1, b1, w2, b2):
    """x_dense: (dims, B, N, D), mask: (dims, B, N), w1: (dims, D, H),
    b1: (dims, 1, H), w2: (H, out), b2: (1, out)."""
    n_dims, B, N, D = x_dense.shape
    H = w1.shape[-1]
    out_size = w2.shape[-1]

    # ---- host-side layout plumbing (no compute moved out of the kernel) ----
    C1, C2 = n_dims * D, n_dims * H
    C1p = _round_up(C1, 128)                 # 96  -> 128  (lane-dense pooled)
    C2p = _round_up(C2, 128)                 # 192 -> 256  (lane-dense hidden)
    OUTp = _round_up(out_size, 128)          # 8   -> 128  (unmasked vst)
    Bp = _round_up(B, 8)                     # 2   -> 8    (full sublane group)
    Np = _round_up(N, 8)                     # 16  -> 16

    # Interleave the cochain dims into the lane axis: x_big[b,n,d*D+k] = x[d,b,n,k]
    x_big = jnp.transpose(x_dense, (1, 2, 0, 3)).reshape(B, N, C1)
    # Mask broadcast over feature lanes: m_big[b,n,d*D+k] = mask[d,b,n]
    m_big = jnp.repeat(jnp.transpose(mask, (1, 2, 0)), D, axis=2)
    x_big = jnp.pad(x_big, ((0, Bp - B), (0, Np - N), (0, C1p - C1)))
    m_big = jnp.pad(m_big, ((0, Bp - B), (0, Np - N), (0, C1p - C1)))

    # Block-diagonal fused lin1: W1_bd[d*D+i, d*H+j] = w1[d,i,j]
    w1_blocks = [
        jnp.pad(w1[d], ((0, 0), (d * H, (n_dims - 1 - d) * H)))
        for d in range(n_dims)
    ]
    w1_bd = jnp.pad(jnp.concatenate(w1_blocks, axis=0),
                    ((0, C1p - C1), (0, C2p - C2)))               # (C1p, C2p)
    b1_cat = jnp.pad(b1.reshape(1, C2), ((0, 0), (0, C2p - C2)))  # (1, C2p)

    # Row-tiled lin2 absorbs the final 'sum over dims' readout.
    w2_big = jnp.pad(jnp.concatenate([w2] * n_dims, axis=0),
                     ((0, C2p - C2), (0, OUTp - out_size)))       # (C2p, OUTp)
    b2_p = jnp.pad(b2, ((0, 0), (0, OUTp - out_size)))            # (1, OUTp)

    def vmem_spec():
        return pl.BlockSpec(memory_space=pltpu.MemorySpace.VMEM)

    y_pad = pl.pallas_call(
        gcnc_mlp_kernel,
        out_shape=jax.ShapeDtypeStruct((Bp, OUTp), jnp.float32),
        in_specs=[vmem_spec() for _ in range(6)],
        out_specs=vmem_spec(),
    )(x_big, m_big, w1_bd, b1_cat, w2_big, b2_p)

    return y_pad[:B, :out_size]


def reference(x_dense, mask, w1, b1, w2, b2):
    n_dims = x_dense.shape[0]
    acc = None
    for d in range(n_dims):
        pooled = jnp.einsum("bn,bnd->bd", mask[d], x_dense[d])
        h = jax.nn.relu(pooled @ w1[d] + b1[d, 0])
        acc = h if acc is None else acc + h
    return acc @ w2 + b2[0]


if __name__ == "__main__":
    # Small shapes consistent with the module.
    B = 2                 # batch (num_data)
    N = 16                # padded max_num of cells per dim
    D = 32                # embed_dim
    MULT = 2              # final_hidden_multiplier
    H = MULT * D          # 64
    OUT = 8               # out_size
    NDIMS = 3             # max_dim + 1

    key = jax.random.PRNGKey(0)
    k_x, k_g, k_cnt, k_w1, k_b1, k_w2, k_b2 = jax.random.split(key, 7)

    # Per-batch, per-dim valid cell counts -> masks (what init_data_to_dense_gcnc builds).
    counts = jax.random.randint(k_cnt, (NDIMS, B), minval=3, maxval=N + 1)
    pos = jnp.arange(N)[None, None, :]                                # (1,1,N)
    mask = (pos < counts[:, :, None]).astype(jnp.float32)             # (3,B,N)

    # Dense cochain features (get_dense_x output).  Invalid slots deliberately
    # contain GARBAGE (not zero) so the in-kernel mask path is exercised.
    x_valid = jax.random.normal(k_x, (NDIMS, B, N, D), jnp.float32)
    garbage = 100.0 * jax.random.normal(k_g, (NDIMS, B, N, D), jnp.float32)
    x_dense = x_valid * mask[..., None] + garbage * (1.0 - mask[..., None])

    # Deterministic parameter init (PyTorch Linear-style uniform scaling).
    w1 = jax.random.uniform(k_w1, (NDIMS, D, H), jnp.float32,
                            -1.0 / jnp.sqrt(D), 1.0 / jnp.sqrt(D))
    b1 = jax.random.uniform(k_b1, (NDIMS, 1, H), jnp.float32,
                            -1.0 / jnp.sqrt(D), 1.0 / jnp.sqrt(D))
    w2 = jax.random.uniform(k_w2, (H, OUT), jnp.float32,
                            -1.0 / jnp.sqrt(H), 1.0 / jnp.sqrt(H))
    b2 = jax.random.uniform(k_b2, (1, OUT), jnp.float32,
                            -1.0 / jnp.sqrt(H), 1.0 / jnp.sqrt(H))

    out = gcnc_mlp_forward(x_dense, mask, w1, b1, w2, b2)
    out = jax.block_until_ready(out)

    ref = reference(x_dense, mask, w1, b1, w2, b2)
    assert out.shape == (B, OUT)
    assert jnp.allclose(out, ref, atol=1e-4, rtol=1e-4), (out, ref)

    print("KERNEL_OK")
</pallas_src>

<mosaic_0001>
module attributes {stable_mosaic.version = 11 : i64} {
  func.func @gcnc_mlp_kernel(%arg0: memref<8x16x128xf32, #tpu.memory_space<vmem>>, %arg1: memref<8x16x128xf32, #tpu.memory_space<vmem>>, %arg2: memref<128x256xf32, #tpu.memory_space<vmem>>, %arg3: memref<1x256xf32, #tpu.memory_space<vmem>>, %arg4: memref<256x128xf32, #tpu.memory_space<vmem>>, %arg5: memref<1x128xf32, #tpu.memory_space<vmem>>, %arg6: memref<8x128xf32, #tpu.memory_space<vmem>>) attributes {dimension_semantics = [], scalar_prefetch = 0 : i64, scratch_operands = 0 : i64, tpu.core_type = #tpu.core_type<tc>} {
    %c0 = arith.constant 0 : index
    %c0_0 = arith.constant 0 : index
    %c0_1 = arith.constant 0 : index
    %0 = vector.load %arg0[%c0, %c0_0, %c0_1] : memref<8x16x128xf32, #tpu.memory_space<vmem>>, vector<8x16x128xf32>
    %c0_2 = arith.constant 0 : index
    %c0_3 = arith.constant 0 : index
    %c0_4 = arith.constant 0 : index
    %1 = vector.load %arg1[%c0_2, %c0_3, %c0_4] : memref<8x16x128xf32, #tpu.memory_space<vmem>>, vector<8x16x128xf32>
    %2 = arith.mulf %0, %1 : vector<8x16x128xf32>
    %cst = arith.constant dense<0.000000e+00> : vector<8x128xf32>
    %3 = vector.multi_reduction <add>, %2, %cst [1] : vector<8x16x128xf32> to vector<8x128xf32>
    %c0_5 = arith.constant 0 : index
    %c0_6 = arith.constant 0 : index
    %4 = vector.load %arg2[%c0_5, %c0_6] : memref<128x256xf32, #tpu.memory_space<vmem>>, vector<128x256xf32>
    %cst_7 = arith.constant dense<0.000000e+00> : vector<8x256xf32>
    %5 = tpu.matmul %3, %4, %cst_7 {dimension_numbers = #tpu.dot_dimension_numbers<[1], [0], [0], [1], [0, 0, 1, 1], [], []>} : vector<8x128xf32>, vector<128x256xf32>, vector<8x256xf32> -> vector<8x256xf32>
    %c0_8 = arith.constant 0 : index
    %c0_9 = arith.constant 0 : index
    %6 = vector.load %arg3[%c0_8, %c0_9] : memref<1x256xf32, #tpu.memory_space<vmem>>, vector<1x256xf32>
    %7 = vector.broadcast %6 : vector<1x256xf32> to vector<8x256xf32>
    %8 = arith.addf %5, %7 : vector<8x256xf32>
    %cst_10 = arith.constant 0.000000e+00 : f32
    %9 = vector.broadcast %cst_10 : f32 to vector<8x256xf32>
    %10 = arith.maximumf %8, %9 : vector<8x256xf32>
    %c0_11 = arith.constant 0 : index
    %c0_12 = arith.constant 0 : index
    %11 = vector.load %arg4[%c0_11, %c0_12] : memref<256x128xf32, #tpu.memory_space<vmem>>, vector<256x128xf32>
    %cst_13 = arith.constant dense<0.000000e+00> : vector<8x128xf32>
    %12 = tpu.matmul %10, %11, %cst_13 {dimension_numbers = #tpu.dot_dimension_numbers<[1], [0], [0], [1], [0, 0, 1, 1], [], []>} : vector<8x256xf32>, vector<256x128xf32>, vector<8x128xf32> -> vector<8x128xf32>
    %c0_14 = arith.constant 0 : index
    %c0_15 = arith.constant 0 : index
    %13 = vector.load %arg5[%c0_14, %c0_15] : memref<1x128xf32, #tpu.memory_space<vmem>>, vector<1x128xf32>
    %14 = vector.broadcast %13 : vector<1x128xf32> to vector<8x128xf32>
    %15 = arith.addf %12, %14 : vector<8x128xf32>
    %c0_16 = arith.constant 0 : index
    %c0_17 = arith.constant 0 : index
    %16 = vector.load %arg6[%c0_16, %c0_17] : memref<8x128xf32, #tpu.memory_space<vmem>>, vector<8x128xf32>
    tpu.vector_store %arg6[%c0_16, %c0_17], %15 {strides = array<i32>} : memref<8x128xf32, #tpu.memory_space<vmem>>, vector<8x128xf32>,
    return
  }
}

</mosaic_0001>

<bundles_post_ra>
// kernel: tpu_custom_call.1
= control target key start
LH: loop header
LB: loop body
LE: loop exit
PB: predicated region body
PF: predicated region fallthrough
CT: control target
= control target key end

     0   :  { %11 = vsyncpa [#allocation3], 0  ;;  %s859_s0 = inlined_call_operand.hbm [shape: f32[8,16,128], index: 0, kind: input, shape index: {}]   ;;  %s860_s1 = inlined_call_operand.hbm [shape: f32[8,16,128], index: 1, kind: input, shape index: {}]   ;;  %s861_s2 = inlined_call_operand.hbm [shape: f32[128,256], index: 2, kind: input, shape index: {}]   ;;  %s862_s3 = inlined_call_operand.vmem [shape: f32[1,256], index: 3, kind: input, shape index: {}]   ;;  %s863_s4 = inlined_call_operand.hbm [shape: f32[256,128], index: 4, kind: input, shape index: {}]   ;;  %s864_s5 = inlined_call_operand.vmem [shape: f32[1,128], index: 5, kind: input, shape index: {}]   ;;  %s865_s6 = inlined_call_operand.hbm [shape: f32[8,128], index: 6, kind: output, shape index: {}]  }
   0x1   :  { %12 = vsyncpa [#allocation6], 0 }
   0x2   :  { %13 = vsyncpa [#allocation9], 0 }
   0x3   :  { %14 = vsyncpa [#allocation4], 0  ;;  %s678_s21 = smov [#allocation5]   ;;  %s679_s23 = smov [#allocation2]  }
   0x4   :  { %s32_s22 = sshll.u32 %s678_s21, 4  ;;  %s20_s24 = sshll.u32 %s679_s23, 4  ;;  %s33_s22 = int_to_ptr.vmem [resolvable:$true] %s32_s22  ;;  %s723_s24 = int_to_ptr.vmem [resolvable:$true] %s20_s24 }
   0x5   :  { %s560_s27 = scalar_lea.hbm %s860_s1, 2048 }
   0x6   :  { %p561_p0 = scmp.ne.s32.totalorder %s860_s1, %s560_s27  ;;  %p564_p1 = scmp.lt.u32.totalorder %s560_s27, %s860_s1 }
   0x8   :  { %p566_p2 = pnand %p564_p1, %p561_p0 }
   0xa   :  { %569 = shalt.err (!%p566_p2)
}
   0xb   :  { %s570_s8 = scalar_lea.vmem %s33_s22, 2048  ;;  %p575_p4 = scmp.lt.s32.totalorder %s33_s22, %s33_s22 }
   0xc   :  { %p571_p3 = scmp.ne.s32.totalorder %s33_s22, %s570_s8  ;;  %p576_p5 = scmp.lt.s32.totalorder %s570_s8, %s570_s8 }
   0xe   :  { %p577_p6 = por %p576_p5, %p575_p4 }
  0x10   :  { %p578_p7 = pnand %p577_p6, %p571_p3 }
  0x12   :  { %581 = shalt.err (!%p578_p7)
}
  0x13   :  { %s680_s9 = smov 128   ;;  %s681_s10 = smov 8  }
  0x14   :  { %38 = dma.hbm_to_vmem [thread:$0]  %s860_s1, 2048, %s33_s22, [#allocation6], %s680_s9, %s680_s9, %s681_s10  }
  0x15   :  { %s582_s15 = scalar_lea.hbm %s859_s0, 2048 }
  0x16   :  { %p583_p8 = scmp.ne.s32.totalorder %s859_s0, %s582_s15  ;;  %p586_p9 = scmp.lt.u32.totalorder %s582_s15, %s859_s0 }
  0x18   :  { %p588_p10 = pnand %p586_p9, %p583_p8 }
  0x1a   :  { %591 = shalt.err (!%p588_p10)
}
  0x1b   :  { %s592_s20 = scalar_lea.vmem %s723_s24, 2048  ;;  %p597_p12 = scmp.lt.s32.totalorder %s723_s24, %s723_s24 }
  0x1c   :  { %p593_p11 = scmp.ne.s32.totalorder %s723_s24, %s592_s20  ;;  %p598_p13 = scmp.lt.s32.totalorder %s592_s20, %s592_s20 }
  0x1e   :  { %p599_p0 = por %p598_p13, %p597_p12 }
  0x20   :  { %p600_p1 = pnand %p599_p0, %p593_p11 }
  0x22   :  { %603 = shalt.err (!%p600_p1)
}
  0x23   :  { %26 = dma.hbm_to_vmem [thread:$0]  %s859_s0, 2048, %s723_s24, [#allocation3], %s680_s9, %s680_s9, %s681_s10  }
  0x24   :  { %s682_s22 = smov [#allocation7]   ;;  %s604_s27 = scalar_lea.hbm %s861_s2, 4096 }
  0x25   :  { %s44_s23 = sshll.u32 %s682_s22, 4  ;;  %p605_p2 = scmp.ne.s32.totalorder %s861_s2, %s604_s27  ;;  %s45_s23 = int_to_ptr.vmem [resolvable:$true] %s44_s23 }
  0x26   :  { %p608_p3 = scmp.lt.u32.totalorder %s604_s27, %s861_s2 }
  0x28   :  { %p610_p4 = pnand %p608_p3, %p605_p2 }
  0x2a   :  { %613 = shalt.err (!%p610_p4)
}
  0x2b   :  { %s614_s8 = scalar_lea.vmem %s45_s23, 4096  ;;  %p619_p6 = scmp.lt.s32.totalorder %s45_s23, %s45_s23 }
  0x2c   :  { %p615_p5 = scmp.ne.s32.totalorder %s45_s23, %s614_s8  ;;  %p620_p7 = scmp.lt.s32.totalorder %s614_s8, %s614_s8 }
  0x2e   :  { %p621_p8 = por %p620_p7, %p619_p6 }
  0x30   :  { %p622_p9 = pnand %p621_p8, %p615_p5 }
  0x32   :  { %625 = shalt.err (!%p622_p9)
}
  0x33   :  { %s683_s0 = smov 256   ;;  %s684_s24 = smov 16  }
  0x34   :  { %50 = dma.hbm_to_vmem [thread:$0]  %s861_s2, 4096, %s45_s23, [#allocation6], %s683_s0, %s683_s0, %s684_s24  }
  0x35   :  { %s685_s13 = smov [#allocation8]   ;;  %s626_s17 = scalar_lea.hbm %s863_s4, 4096 }
  0x36   :  { %s58_s14 = sshll.u32 %s685_s13, 4  ;;  %p627_p10 = scmp.ne.s32.totalorder %s863_s4, %s626_s17  ;;  %s59_s14 = int_to_ptr.vmem [resolvable:$true] %s58_s14 }
  0x37   :  { %p630_p11 = scmp.lt.u32.totalorder %s626_s17, %s863_s4 }
  0x39   :  { %p632_p12 = pnand %p630_p11, %p627_p10 }
  0x3b   :  { %635 = shalt.err (!%p632_p12)
}
  0x3c   :  { %s636_s21 = scalar_lea.vmem %s59_s14, 4096  ;;  %p641_p0 = scmp.lt.s32.totalorder %s59_s14, %s59_s14 }
  0x3d   :  { %p637_p13 = scmp.ne.s32.totalorder %s59_s14, %s636_s21  ;;  %p642_p1 = scmp.lt.s32.totalorder %s636_s21, %s636_s21 }
  0x3f   :  { %p643_p2 = por %p642_p1, %p641_p0 }
  0x41   :  { %p644_p3 = pnand %p643_p2, %p637_p13 }
  0x43   :  { %647 = shalt.err (!%p644_p3)
}
  0x44   :  { %64 = dma.hbm_to_vmem [thread:$0]  %s863_s4, 4096, %s59_s14, [#allocation9], %s680_s9, %s680_s9, %s681_s10  }
  0x45   :  { %670 = dma.done.wait [#allocation3], 2048  }
  0x46   :  { %671 = vsyncadd [#allocation3], 4294965248 }
  0x47   :  { %672 = dma.done.wait [#allocation6], 6144  }
  0x48   :  { %673 = vsyncadd [#allocation6], 4294961152 }
  0x49   :  { %674 = dma.done.wait [#allocation9], 4096  }
  0x4a   :  { %675 = vsyncadd [#allocation9], 4294963200  ;;  %v686_v0 = vmov 0.0   ;;  %v184_v1 = vld [vmem:[#allocation7 + $0x8] sm:$0xff]  ;;  %v186_v2 = vld [vmem:[#allocation7 + $0x18] sm:$0xff]  ;;  %vm235_vm0 = vcmask 1041409  }
  0x4b   :  { %314 = vmatprep.mubr.f32.mxu0 %v686_v0  ;;  %v183_v3 = vld [vmem:[#allocation7] sm:$0xff]  ;;  %v486_v4 = vpack.c.bf16 %v186_v2, %v184_v1  ;;  %v185_v5 = vld [vmem:[#allocation7 + $0x10] sm:$0xff]  ;;  %v188_v6 = vld [vmem:[#allocation7 + $0x28] sm:$0xff]  ;;  %vm237_vm1 = vcmask 1042434   ;;  %vm239_vm2 = vcmask 1043459   ;;  %vm241_vm3 = vcmask 1044484  }
  0x4c   :  { %v190_v7 = vld [vmem:[#allocation7 + $0x38] sm:$0xff]  ;;  %v488_v8 = vpack.c.bf16 %v185_v5, %v183_v3  ;;  %v187_v10 = vld [vmem:[#allocation7 + $0x20] sm:$0xff]  ;;  %v189_v11 = vld [vmem:[#allocation7 + $0x30] sm:$0xff]  ;;  %vm243_vm4 = vcmask 1045509   ;;  %vm245_vm5 = vcmask 1046534   ;;  %vm247_vm6 = vcmask 1047559  }
  0x4d   :  { %v490_v9 = vpack.c.bf16 %v190_v7, %v188_v6  ;;  %v192_v12 = vld [vmem:[#allocation7 + $0x48] sm:$0xff]  ;;  %487 = vmatprep.subr.bf16.mxu0 %v486_v4  ;;  %v194_v13 = vld [vmem:[#allocation7 + $0x58] sm:$0xff]  ;;  %v492_v14 = vpack.c.bf16 %v189_v11, %v187_v10  ;;  %v191_v16 = vld [vmem:[#allocation7 + $0x40] sm:$0xff]  ;;  %s687_s25 = smov [#allocation10]  }
  0x4e   :  { %489 = vmatpush1.bf16.msra.mxu0 %v488_v8  ;;  %v494_v15 = vpack.c.bf16 %v194_v13, %v192_v12  ;;  %v193_v17 = vld [vmem:[#allocation7 + $0x50] sm:$0xff]  ;;  %v196_v18 = vld [vmem:[#allocation7 + $0x68] sm:$0xff]  ;;  %v198_v19 = vld [vmem:[#allocation7 + $0x78] sm:$0xff]  ;;  %s439_s26 = sshll.u32 %s687_s25, 4  ;;  %s440_s26 = int_to_ptr.vmem [resolvable:$true] %s439_s26 }
  0x4f   :  { %491 = vmatprep.subr.bf16.mxu0 %v490_v9  ;;  %v496_v20 = vpack.c.bf16 %v193_v17, %v191_v16  ;;  %v498_v21 = vpack.c.bf16 %v198_v19, %v196_v18  ;;  %v195_v22 = vld [vmem:[#allocation7 + $0x60] sm:$0xff]  ;;  %v197_v23 = vld [vmem:[#allocation7 + $0x70] sm:$0xff]  ;;  %v200_v24 = vld [vmem:[#allocation7 + $0x88] sm:$0xff]  ;;  %p653_p5 = scmp.lt.s32.totalorder %s440_s26, %s440_s26 }
  0x50   :  { %v202_v25 = vld [vmem:[#allocation7 + $0x98] sm:$0xff]  ;;  %v787_v26 = vld [vmem:[#allocation7 + $0x80] sm:$0xff]  ;;  %v789_v27 = vld [vmem:[#allocation7 + $0x90] sm:$0xff]  ;;  %v500_v36 = vpack.c.bf16 %v197_v23, %v195_v22 }
  0x51   :  { %v791_v28 = vld [vmem:[#allocation7 + $0xa8] sm:$0xff]  ;;  %v793_v29 = vld [vmem:[#allocation7 + $0xb8] sm:$0xff]  ;;  %v795_v30 = vld [vmem:[#allocation7 + $0xa0] sm:$0xff]  ;;  %v502_v42 = vpack.c.bf16 %v202_v25, %v200_v24  ;;  %v504_v51 = vpack.c.bf16 %v789_v27, %v787_v26 }
  0x52   :  { %493 = vmatpush1.bf16.msra.mxu0 %v492_v14  ;;  %v797_v31 = vld [vmem:[#allocation7 + $0xb0] sm:$0xff]  ;;  %v799_v32 = vld [vmem:[#allocation7 + $0xc8] sm:$0xff]  ;;  %v801_v33 = vld [vmem:[#allocation7 + $0xd8] sm:$0xff]  ;;  %v506_v55 = vpack.c.bf16 %v793_v29, %v791_v28 }
  0x53   :  { %495 = vmatprep.subr.bf16.mxu0 %v494_v15  ;;  %v803_v34 = vld [vmem:[#allocation7 + $0xc0] sm:$0xff]  ;;  %v805_v35 = vld [vmem:[#allocation7 + $0xd0] sm:$0xff]  ;;  %v807_v37 = vld [vmem:[#allocation7 + $0xe8] sm:$0xff]  ;;  %v508_v56 = vpack.c.bf16 %v797_v31, %v795_v30  ;;  %v510_v57 = vpack.c.bf16 %v801_v33, %v799_v32 }
  0x54   :  { %v809_v38 = vld [vmem:[#allocation7 + $0xf8] sm:$0xff]  ;;  %v79_v39 = vld [vmem:[#allocation2] sm:$0xff]  ;;  %v80_v40 = vld [vmem:[#allocation2 + $0x8] sm:$0xff]  ;;  %v512_v58 = vpack.c.bf16 %v805_v35, %v803_v34 }
  0x55   :  { %v81_v41 = vld [vmem:[#allocation2 + $0x10] sm:$0xff]  ;;  %v811_v43 = vld [vmem:[#allocation7 + $0xe0] sm:$0xff]  ;;  %v82_v45 = vld [vmem:[#allocation2 + $0x18] sm:$0xff]  ;;  %v514_v1 = vpack.c.bf16 %v809_v38, %v807_v37 }
  0x56   :  { %497 = vmatpush1.bf16.msra.mxu0 %v496_v20  ;;  %v813_v44 = vld [vmem:[#allocation7 + $0xf0] sm:$0xff]  ;;  %v83_v46 = vld [vmem:[#allocation2 + $0x20] sm:$0xff]  ;;  %v84_v47 = vld [vmem:[#allocation2 + $0x28] sm:$0xff] }
  0x57   :  { %499 = vmatprep.subr.bf16.mxu0 %v498_v21  ;;  %v85_v48 = vld [vmem:[#allocation2 + $0x30] sm:$0xff]  ;;  %v86_v49 = vld [vmem:[#allocation2 + $0x38] sm:$0xff]  ;;  %v87_v50 = vld [vmem:[#allocation2 + $0x40] sm:$0xff]  ;;  %v516_v9 = vpack.c.bf16 %v813_v44, %v811_v43 }
  0x58   :  { %v88_v52 = vld [vmem:[#allocation2 + $0x48] sm:$0xff]  ;;  %v89_v53 = vld [vmem:[#allocation2 + $0x50] sm:$0xff]  ;;  %v90_v54 = vld [vmem:[#allocation2 + $0x58] sm:$0xff] }
  0x59   :  { %v91_v59 = vld [vmem:[#allocation2 + $0x60] sm:$0xff]  ;;  %v92_v60 = vld [vmem:[#allocation2 + $0x68] sm:$0xff]  ;;  %v93_v61 = vld [vmem:[#allocation2 + $0x70] sm:$0xff] }
  0x5a   :  { %501 = vmatpush1.bf16.msra.mxu0 %v500_v36  ;;  %v95_v62 = vld [vmem:[#allocation5] sm:$0xff]  ;;  %v96_v63 = vld [vmem:[#allocation5 + $0x8] sm:$0xff]  ;;  %v97_v0 = vld [vmem:[#allocation5 + $0x10] sm:$0xff] }
  0x5b   :  { %503 = vmatprep.subr.bf16.mxu0 %v502_v42  ;;  %v94_v2 = vld [vmem:[#allocation2 + $0x78] sm:$0xff]  ;;  %v99_v4 = vld [vmem:[#allocation5 + $0x20] sm:$0xff]  ;;  %v100_v5 = vld [vmem:[#allocation5 + $0x28] sm:$0xff]  ;;  %v111_v6 = vmul.f32 %v95_v62, %v79_v39  ;;  %v112_v7 = vmul.f32 %v96_v63, %v80_v40  ;;  %v113_v8 = vmul.f32 %v97_v0, %v81_v41 }
  0x5c   :  { %v98_v3 = vld [vmem:[#allocation5 + $0x18] sm:$0xff]  ;;  %v101_v10 = vld [vmem:[#allocation5 + $0x30] sm:$0xff]  ;;  %v103_v12 = vld [vmem:[#allocation5 + $0x40] sm:$0xff]  ;;  %v115_v14 = vmul.f32 %v99_v4, %v83_v46  ;;  %v116_v15 = vmul.f32 %v100_v5, %v84_v47 }
  0x5d   :  { %v102_v11 = vld [vmem:[#allocation5 + $0x38] sm:$0xff]  ;;  %v114_v13 = vmul.f32 %v98_v3, %v82_v45  ;;  %v104_v16 = vld [vmem:[#allocation5 + $0x48] sm:$0xff]  ;;  %v105_v17 = vld [vmem:[#allocation5 + $0x50] sm:$0xff]  ;;  %v117_v19 = vmul.f32 %v101_v10, %v85_v48  ;;  %v119_v21 = vmul.f32 %v103_v12, %v87_v50  ;;  %v127_v22 = vadd.f32 %v112_v7, %v111_v6 }
  0x5e   :  { %v106_v18 = vld [vmem:[#allocation5 + $0x58] sm:$0xff]  ;;  %v118_v20 = vmul.f32 %v102_v11, %v86_v49  ;;  %505 = vmatpush1.bf16.msra.mxu0 %v504_v51  ;;  %v107_v23 = vld [vmem:[#allocation5 + $0x60] sm:$0xff]  ;;  %v108_v24 = vld [vmem:[#allocation5 + $0x68] sm:$0xff]  ;;  %v120_v26 = vmul.f32 %v104_v16, %v88_v52  ;;  %v121_v27 = vmul.f32 %v105_v17, %v89_v53  ;;  %v141_v41 = vadd.f32 %v116_v15, %v115_v14 }
  0x5f   :  { %v109_v25 = vld [vmem:[#allocation5 + $0x70] sm:$0xff]  ;;  %v122_v28 = vmul.f32 %v106_v18, %v90_v54  ;;  %v134_v29 = vadd.f32 %v114_v13, %v113_v8  ;;  %507 = vmatprep.subr.bf16.mxu0 %v506_v55  ;;  %v110_v30 = vld [vmem:[#allocation5 + $0x78] sm:$0xff]  ;;  %v123_v31 = vmul.f32 %v107_v23, %v91_v59  ;;  %v124_v32 = vmul.f32 %v108_v24, %v92_v60  ;;  %v339_v16 = vld [vmem:[#allocation8 + $0x80] sm:$0xff] }
  0x60   :  { %v125_v33 = vmul.f32 %v109_v25, %v93_v61  ;;  %v128_v36 = vrot.slane %v127_v22, 4  ;;  %v126_v39 = vmul.f32 %v110_v30, %v94_v2  ;;  %v148_v42 = vadd.f32 %v118_v20, %v117_v19  ;;  %v340_v17 = vld [vmem:[#allocation8 + $0x88] sm:$0xff]  ;;  %v323_v20 = vld [vmem:[#allocation8] sm:$0xff]  ;;  %v326_v43 = vld [vmem:[#allocation8 + $0x18] sm:$0xff] }
  0x61   :  { %v135_v40 = vrot.slane %v134_v29, 4  ;;  %v155_v46 = vadd.f32 %v120_v26, %v119_v21  ;;  %v162_v47 = vadd.f32 %v122_v28, %v121_v27  ;;  %v169_v48 = vadd.f32 %v124_v32, %v123_v31  ;;  %v324_v21 = vld [vmem:[#allocation8 + $0x8] sm:$0xff]  ;;  %v341_v26 = vld [vmem:[#allocation8 + $0x90] sm:$0xff]  ;;  %v342_v27 = vld [vmem:[#allocation8 + $0x98] sm:$0xff] }
  0x62   :  { %v129_v45 = vadd.f32 %v128_v36, %v127_v22  ;;  %509 = vmatpush1.bf16.msra.mxu0 %v508_v56  ;;  %v142_v50 = vrot.slane %v141_v41, 4  ;;  %v149_v51 = vrot.slane %v148_v42, 4  ;;  %v176_v52 = vadd.f32 %v126_v39, %v125_v33  ;;  %v325_v32 = vld [vmem:[#allocation8 + $0x10] sm:$0xff]  ;;  %v343_v36 = vld [vmem:[#allocation8 + $0xa0] sm:$0xff]  ;;  %v344_v39 = vld [vmem:[#allocation8 + $0xa8] sm:$0xff] }
  0x63   :  { %v136_v49 = vadd.f32 %v135_v40, %v134_v29  ;;  %511 = vmatprep.subr.bf16.mxu0 %v510_v57  ;;  %v156_v54 = vrot.slane %v155_v46, 4  ;;  %v163_v55 = vrot.slane %v162_v47, 4  ;;  %v170_v59 = vrot.slane %v169_v48, 4 }
  0x64   :  { %v130_v53 = vrot.slane %v129_v45, 2  ;;  %v143_v61 = vadd.f32 %v142_v50, %v141_v41  ;;  %v150_v62 = vadd.f32 %v149_v51, %v148_v42  ;;  %v177_v63 = vrot.slane %v176_v52, 4  ;;  %v327_v50 = vld [vmem:[#allocation8 + $0x20] sm:$0xff]  ;;  %v328_v51 = vld [vmem:[#allocation8 + $0x28] sm:$0xff] }
  0x65   :  { %v137_v60 = vrot.slane %v136_v49, 2  ;;  %v157_v2 = vadd.f32 %v156_v54, %v155_v46  ;;  %v164_v3 = vadd.f32 %v163_v55, %v162_v47  ;;  %v171_v4 = vadd.f32 %v170_v59, %v169_v48  ;;  %v346_v54 = vld [vmem:[#allocation8 + $0xb8] sm:$0xff] }
  0x66   :  { %v131_v0 = vadd.f32 %v130_v53, %v129_v45  ;;  %513 = vmatpush1.bf16.msra.mxu0 %v512_v58  ;;  %v144_v57 = vrot.slane %v143_v61, 2  ;;  %v151_v5 = vrot.slane %v150_v62, 2  ;;  %v178_v6 = vadd.f32 %v177_v63, %v176_v52  ;;  %v345_v53 = vld [vmem:[#allocation8 + $0xb0] sm:$0xff]  ;;  %v330_v63 = vld [vmem:[#allocation8 + $0x38] sm:$0xff] }
  0x67   :  { %v138_v56 = vadd.f32 %v137_v60, %v136_v49  ;;  %515 = vmatprep.subr.bf16.mxu0 %v514_v1  ;;  %v158_v8 = vrot.slane %v157_v2, 2  ;;  %v165_v10 = vrot.slane %v164_v3, 2  ;;  %v172_v11 = vrot.slane %v171_v4, 2 }
  0x68   :  { %v132_v7 = vrot.slane %v131_v0, 1  ;;  %v145_v13 = vadd.f32 %v144_v57, %v143_v61  ;;  %v152_v14 = vadd.f32 %v151_v5, %v150_v62  ;;  %v179_v15 = vrot.slane %v178_v6, 2  ;;  %v329_v62 = vld [vmem:[#allocation8 + $0x30] sm:$0xff]  ;;  %v332_v57 = vld [vmem:[#allocation8 + $0x48] sm:$0xff] }
  0x69   :  { %v139_v12 = vrot.slane %v138_v56, 1  ;;  %v159_v35 = vadd.f32 %v158_v8, %v157_v2  ;;  %v166_v58 = vadd.f32 %v165_v10, %v164_v3  ;;  %v173_v18 = vadd.f32 %v172_v11, %v171_v4  ;;  %v348_v2 = vld [vmem:[#allocation8 + $0xc8] sm:$0xff]  ;;  %v349_v5 = vld [vmem:[#allocation8 + $0xd0] sm:$0xff]  ;;  %v334_v11 = vld [vmem:[#allocation8 + $0x58] sm:$0xff] }
  0x6a   :  { %v133_v34 = vadd.f32 %v132_v7, %v131_v0  ;;  %517 = vmatpush1.bf16.msra.mxu0 %v516_v9  ;;  %v146_v38 = vrot.slane %v145_v13, 1  ;;  %v153_v1 = vrot.slane %v152_v14, 1  ;;  %v180_v19 = vadd.f32 %v179_v15, %v178_v6  ;;  %v347_v0 = vld [vmem:[#allocation8 + $0xc0] sm:$0xff]  ;;  %v350_v6 = vld [vmem:[#allocation8 + $0xd8] sm:$0xff]  ;;  %v333_v10 = vld [vmem:[#allocation8 + $0x50] sm:$0xff] }
  0x6b   :  { %v140_v37 = vadd.f32 %v139_v12, %v138_v56  ;;  %v160_v22 = vrot.slane %v159_v35, 1  ;;  %v167_v23 = vrot.slane %v166_v58, 1  ;;  %v174_v24 = vrot.slane %v173_v18, 1  ;;  %v331_v56 = vld [vmem:[#allocation8 + $0x40] sm:$0xff] }
  0x6c   :  { %v518_v25 = vpack.c.bf16 %v340_v17, %v339_v16  ;;  %v147_v28 = vadd.f32 %v146_v38, %v145_v13  ;;  %v154_v29 = vadd.f32 %v153_v1, %v152_v14  ;;  %v181_v30 = vrot.slane %v180_v19, 1  ;;  %v351_v12 = vld [vmem:[#allocation8 + $0xe0] sm:$0xff]  ;;  %v352_v13 = vld [vmem:[#allocation8 + $0xe8] sm:$0xff]  ;;  %v338_v38 = vld [vmem:[#allocation8 + $0x78] sm:$0xff] }
  0x6d   :  { %v236_v31 = vsel %vm235_vm0, %v140_v37, %v133_v34  ;;  %v161_v44 = vadd.f32 %v160_v22, %v159_v35  ;;  %v168_v9 = vadd.f32 %v167_v23, %v166_v58  ;;  %v520_v33 = vpack.c.bf16 %v324_v21, %v323_v20  ;;  %v335_v16 = vld [vmem:[#allocation8 + $0x60] sm:$0xff]  ;;  %v336_v17 = vld [vmem:[#allocation8 + $0x68] sm:$0xff]  ;;  %v353_v35 = vld [vmem:[#allocation8 + $0xf0] sm:$0xff] }
  0x6e   :  { %519 = vmatprep.subr.bf16.mxu1 %v518_v25  ;;  %v175_v40 = vadd.f32 %v174_v24, %v173_v18  ;;  %v238_v41 = vsel %vm237_vm1, %v147_v28, %v236_v31  ;;  %v522_v42 = vpack.c.bf16 %v342_v27, %v341_v26  ;;  %v182_v45 = vadd.f32 %v181_v30, %v180_v19  ;;  %v354_v58 = vld [vmem:[#allocation8 + $0xf8] sm:$0xff]  ;;  %v337_v37 = vld [vmem:[#allocation8 + $0x70] sm:$0xff]  ;;  %v215_v22 = vld [vmem:[%s862_s3] sm:$0x3]  ;;  %s648_s3 = scalar_lea.vmem %s440_s26, 128 }
  0x6f   :  { %v240_v46 = vsel %vm239_vm2, %v154_v29, %v238_v41  ;;  %521 = vmatpush3.bf16.msra.mxu1 %v520_v33  ;;  %v524_v47 = vpack.c.bf16 %v326_v43, %v325_v32  ;;  %v526_v49 = vpack.c.bf16 %v344_v39, %v343_v36  ;;  %v528_v60 = vpack.c.bf16 %v328_v51, %v327_v50  ;;  %v450_v43 = vld [vmem:[%s864_s5] ss:$0 sm:$0xff]  ;;  %p649_p4 = scmp.ne.s32.totalorder %s440_s26, %s648_s3  ;;  %p654_p6 = scmp.lt.s32.totalorder %s648_s3, %s648_s3 }
  0x70   :  { %v242_v48 = vsel %vm241_vm3, %v161_v44, %v240_v46  ;;  %523 = vmatprep.subr.bf16.mxu1 %v522_v42  ;;  %v530_v61 = vpack.c.bf16 %v346_v54, %v345_v53  ;;  %v532_v3 = vpack.c.bf16 %v330_v63, %v329_v62  ;;  %v534_v4 = vpack.c.bf16 %v348_v2, %v347_v0 }
  0x71   :  { %v244_v52 = vsel %vm243_vm4, %v168_v9, %v242_v48  ;;  %v536_v7 = vpack.c.bf16 %v332_v57, %v331_v56  ;;  %v538_v8 = vpack.c.bf16 %v350_v6, %v349_v5  ;;  %v540_v14 = vpack.c.bf16 %v334_v11, %v333_v10  ;;  %p655_p7 = por %p654_p6, %p653_p5 }
  0x72   :  { %v246_v55 = vsel %vm245_vm5, %v175_v40, %v244_v52  ;;  %v542_v15 = vpack.c.bf16 %v352_v13, %v351_v12  ;;  %v544_v34 = vpack.c.bf16 %v336_v17, %v335_v16  ;;  %v546_v18 = vpack.c.bf16 %v354_v58, %v353_v35 }
  0x73   :  { %v248_v59 = vsel %vm247_vm6, %v182_v45, %v246_v55  ;;  %525 = vmatpush3.bf16.msra.mxu1 %v524_v47  ;;  %v548_v1 = vpack.c.bf16 %v338_v38, %v337_v37  ;;  %v217_v19 = vlaneseq  ;;  %p656_p8 = pnand %p655_p7, %p649_p4 }
  0x74   :  { %315 = vmatmul.mubr.f32.vlgmr.msra.gmra.mrb[0].mxu0 %v248_v59  ;;  %527 = vmatprep.subr.bf16.mxu1 %v526_v49 }
  0x75   :  { %v218_v20 = vshrl.u32 %v217_v19, 7 }
  0x77   :  { %529 = vmatpush3.bf16.msra.mxu1 %v528_v60  ;;  %v219_v21 = vsub.s32 0, %v218_v20  ;;  %v223_v23 = vsub.s32 1, %v218_v20 }
  0x78   :  { %531 = vmatprep.subr.bf16.mxu1 %v530_v61 }
  0x79   :  { %v220_v24 = vrot.slane %v215_v22, %v219_v21  ;;  %v224_v25 = vrot.slane %v215_v22, %v223_v23 }
  0x7b   :  { %533 = vmatpush3.bf16.msra.mxu1 %v532_v3 }
  0x7c   :  { %535 = vmatprep.subr.bf16.mxu1 %v534_v4 }
  0x7f   :  { %537 = vmatpush3.bf16.msra.mxu1 %v536_v7 }
  0x80   :  { %539 = vmatprep.subr.bf16.mxu1 %v538_v8 }
  0x83   :  { %541 = vmatpush3.bf16.msra.mxu1 %v540_v14 }
  0x84   :  { %543 = vmatprep.subr.bf16.mxu1 %v542_v15 }
  0x87   :  { %545 = vmatpush3.bf16.msra.mxu1 %v544_v34 }
  0x88   :  { %547 = vmatprep.subr.bf16.mxu1 %v546_v18 }
  0x8b   :  { %549 = vmatpush3.bf16.msra.mxu1 %v548_v1 }
 0x147   :  { %v316_v26 = vpop.f32.mrb[0].mxu0 }
 0x148   :  { %v317_v27 = vadd.f32 %v316_v26, %v220_v24  ;;  %v318_v28 = vpop.f32.mrb[1].mxu0 }
 0x149   :  { %v319_v29 = vadd.f32 %v318_v28, %v224_v25 }
 0x14a   :  { %v321_v31 = vmax.f32 %v317_v27, 0.0 }
 0x14b   :  { %v322_v30 = vmax.f32 %v319_v29, 0.0 }
 0x14d   :  { %426 = vmatprep.mubr.f32.mxu1 %v322_v30 }
 0x14e   :  { %427 = vmatmul.mubr.f32.vlgmr.msra.gmra.mrb[0].mxu1 %v321_v31 }
 0x221   :  { %v483_v32 = vpop.f32.mrb[0].mxu1 }
 0x222   :  { %v484_v44 = vpop.f32.mrb[1].mxu1 }
 0x223   :  { %v485_v9 = vadd.f32 %v484_v44, %v483_v32 }
 0x225   :  { %v429_v33 = vadd.f32 %v485_v9, %v450_v43 }
 0x227   :  { %432 = vst [vmem:[#allocation10] sm:$0xff] %v429_v33 }
 0x228   :  { %659 = shalt.err (!%p656_p8)
}
 0x229   :  { %s660_s29 = scalar_lea.hbm %s865_s6, 128 }
 0x22a   :  { %p661_p9 = scmp.ne.s32.totalorder %s865_s6, %s660_s29  ;;  %p664_p10 = scmp.lt.u32.totalorder %s660_s29, %s865_s6 }
 0x22c   :  { %p666_p11 = pnand %p664_p10, %p661_p9 }
 0x22e   :  { %669 = shalt.err (!%p666_p11)
}
 0x22f   :  { %442 = dma.vmem_to_hbm [thread:$0]  %s440_s26, 128, %s865_s6, [#allocation4]  }
 0x230   :  { %676 = dma.done.wait [#allocation4], 128  }
 0x231   :  { %677 = vsyncadd [#allocation4], 4294967168 }
 0x232   :  { %446 = vsyncpa [#allocation3], 1 }
 0x233   :  { %447 = vsyncpa [#allocation6], 1 }
 0x234   :  { %448 = vsyncpa [#allocation9], 1 }
 0x235   :  { %449 = vsyncpa [#allocation4], 1 }

</bundles_post_ra>
